<compile_context>
chip_gen: v6e
topology: v6e:2x2x1
jax: 0.10.0
libtpu: 0.0.40
codegen_flags: <defaults>
</compile_context>

<pallas_src>
import functools

import numpy as np
import jax
import jax.numpy as jnp
from jax.experimental import pallas as pl
from jax.experimental.pallas import tpu as pltpu


def policy_kernel(x_ref, ex_ref, wc_ref, bc_ref, wlc_ref, wle_ref, o_ref):
    """One batch tile.

    x_ref   (25, TB, 100) bf16 VMEM : depth patches, x[k, b, p],
                                      k = kh*5+kw, p = oh*10+ow
    ex_ref  (TB, 32)      f32  VMEM : [angles(8), ang_vel(8), base_pos(3),
                                       base_orn(3), 1.0 (bias col), zeros(9)]
    wc_ref  (2, 25)       f32  SMEM : conv weight per (channel, tap)
    bc_ref  (2,)          f32  SMEM : conv bias per channel
    wlc_ref (2, 100, OUT) f32  VMEM : linear weight rows for conv channels 0/1
    wle_ref (32, OUT)     f32  VMEM : linear weight rows for extras (+ bias row)
    o_ref   (TB, OUT)     f32  VMEM
    """
    tb = x_ref.shape[1]
    acc0 = jnp.zeros((tb, 100), jnp.float32)
    acc1 = jnp.zeros((tb, 100), jnp.float32)

    # Conv2d(1->2, k=5, s=5) as a fully-unrolled per-tap FMA sweep: each bf16
    # tap slice is read once and accumulated into both output channels.  The
    # bf16 * f32-scalar multiply promotes to f32, so accumulation stays f32
    # (on v5e the compiler inserts the per-tap upconvert; no whole-block cast).
    for k in range(25):
        xk = x_ref[k]                      # (TB, 100) bf16, sublane=batch lane=pixel
        acc0 = acc0 + xk * wc_ref[0, k]    # scalar broadcast from SMEM -> pure VALU
        acc1 = acc1 + xk * wc_ref[1, k]

    f0 = jnp.tanh(acc0 + bc_ref[0])        # (TB, 100)
    f1 = jnp.tanh(acc1 + bc_ref[1])

    # Linear(222 -> out) + sigmoid.  The concat (and the NCHW flatten order) is
    # folded into three small matmuls; the linear bias rides on the ones column
    # of the extras block.  MXU work here is negligible -- leave OUT=4 as-is.
    logits = (
        jnp.dot(f0, wlc_ref[0], preferred_element_type=jnp.float32)
        + jnp.dot(f1, wlc_ref[1], preferred_element_type=jnp.float32)
        + jnp.dot(ex_ref[...], wle_ref[...], preferred_element_type=jnp.float32)
    )                                      # (TB, OUT)
    o_ref[...] = jax.nn.sigmoid(logits)


def init_params(seed: int = 0, out: int = 4):
    """Deterministic synthetic parameters with the PyTorch module's shapes."""
    key = jax.random.PRNGKey(seed)
    k1, k2, k3, k4 = jax.random.split(key, 4)
    conv_w = jax.random.uniform(k1, (2, 1, 5, 5), jnp.float32, -0.2, 0.2)   # Conv2d weight
    conv_b = jax.random.uniform(k2, (2,), jnp.float32, -0.2, 0.2)           # Conv2d bias
    lin_w = jax.random.uniform(k3, (out, 222), jnp.float32, -0.067, 0.067)  # Linear weight
    lin_b = jax.random.uniform(k4, (out,), jnp.float32, -0.067, 0.067)      # Linear bias
    return conv_w, conv_b, lin_w, lin_b


def prepare_kernel_params(conv_w, conv_b, lin_w, lin_b):
    """Rearrange PyTorch-shaped params into the small buffers the kernel uses."""
    out = int(lin_w.shape[0])
    wc = np.asarray(conv_w, dtype=np.float32).reshape(2, 25)        # (channel, tap)
    bc = np.asarray(conv_b, dtype=np.float32)                       # (2,)
    lw = np.asarray(lin_w, dtype=np.float32)                        # (out, 222)
    lb = np.asarray(lin_b, dtype=np.float32)                        # (out,)
    # NCHW flatten order (c*100 + p) folded into the row order of the weight slabs.
    wlc = np.zeros((2, 100, out), dtype=np.float32)
    wlc[0] = lw[:, 0:100].T           # conv channel 0 features
    wlc[1] = lw[:, 100:200].T         # conv channel 1 features
    wle = np.zeros((32, out), dtype=np.float32)
    wle[:22, :] = lw[:, 200:222].T    # extras (angles/ang_vel/base_pos/base_orn)
    wle[22, :] = lb                   # linear bias via the ones column of extras
    return dict(wc=jnp.asarray(wc), bc=jnp.asarray(bc),
                wlc=jnp.asarray(wlc), wle=jnp.asarray(wle))


def _round_up(n, m):
    return ((n + m - 1) // m) * m


@functools.partial(jax.jit, static_argnames=("tb",))
def policy_forward(depth, angles, ang_vel, base_pos, base_orn, params, tb=512):
    wc, bc, wlc, wle = params["wc"], params["bc"], params["wlc"], params["wle"]
    B = depth.shape[0]
    out = wlc.shape[2]

    # Tap-major im2col of the stride-5 / kernel-5 / pad-0 conv (non-overlapping
    # 5x5 tiles).  Cast to bf16 FIRST so XLA fuses cast+transpose+pad into one
    # HBM pass: (B,1,50,50) -> (B,oh,kh,ow,kw) -> (kh,kw,B,oh,ow) -> (25,B,100).
    d = depth.astype(jnp.bfloat16)
    x = d.reshape(B, 10, 5, 10, 5).transpose(2, 4, 0, 1, 3).reshape(25, B, 100)

    ex = jnp.concatenate(
        [angles, ang_vel, base_pos, base_orn,
         jnp.ones((B, 1), jnp.float32),            # ones column -> carries linear bias
         jnp.zeros((B, 9), jnp.float32)],          # pad 23 -> 32 lanes
        axis=1).astype(jnp.float32)

    # Batch-tile selection.
    tb = min(tb, _round_up(B, 8))
    # v7x megacore: keep the ("parallel",) grid >= 2 steps when the batch can split.
    if B > 8 and _round_up(B, tb) // tb < 2:
        tb = _round_up((B + 1) // 2, 8)
    Bp = _round_up(B, tb)
    if Bp != B:
        x = jnp.pad(x, ((0, 0), (0, Bp - B), (0, 0)))
        ex = jnp.pad(ex, ((0, Bp - B), (0, 0)))

    result = pl.pallas_call(
        policy_kernel,
        out_shape=jax.ShapeDtypeStruct((Bp, out), jnp.float32),
        grid=(Bp // tb,),
        in_specs=[
            pl.BlockSpec((25, tb, 100), lambda i: (0, i, 0)),      # x: tiled over batch
            pl.BlockSpec((tb, 32), lambda i: (i, 0)),              # extras: tiled over batch
            pl.BlockSpec(memory_space=pltpu.MemorySpace.SMEM),     # conv weight (2,25)
            pl.BlockSpec(memory_space=pltpu.MemorySpace.SMEM),     # conv bias (2,)
            pl.BlockSpec((2, 100, out), lambda i: (0, 0, 0)),      # linear weight (conv part)
            pl.BlockSpec((32, out), lambda i: (0, 0)),             # linear weight (extras+bias)
        ],
        out_specs=pl.BlockSpec((tb, out), lambda i: (i, 0)),
        compiler_params=pltpu.CompilerParams(
            dimension_semantics=("parallel",),
            vmem_limit_bytes=32 * 1024 * 1024,   # safe on v7x (64 MiB physical) too
        ),
    )(x, ex, wc, bc, wlc, wle)
    return result[:B]


def reference_forward(depth, angles, ang_vel, base_pos, base_orn, conv_w, conv_b, lin_w, lin_b):
    """Plain-JAX f32 reference mirroring the PyTorch forward (for verification)."""
    B = depth.shape[0]
    y = jax.lax.conv_general_dilated(
        depth, conv_w, window_strides=(5, 5), padding="VALID",
        dimension_numbers=("NCHW", "OIHW", "NCHW"))
    y = jnp.tanh(y + conv_b[None, :, None, None])            # (B,2,10,10)
    flat = y.reshape(B, -1)                                   # (B,200)
    inputs = jnp.concatenate([flat, angles, ang_vel, base_pos, base_orn], axis=1)
    return jax.nn.sigmoid(inputs @ lin_w.T + lin_b)


if __name__ == "__main__":
    conv_w, conv_b, lin_w, lin_b = init_params(seed=0, out=4)
    kparams = prepare_kernel_params(conv_w, conv_b, lin_w, lin_b)

    # Small demo batch (B=2), single grid step.
    B = 2
    key = jax.random.PRNGKey(0)
    kd, ka, kv, kp_, ko = jax.random.split(key, 5)
    depth = jax.random.normal(kd, (B, 1, 50, 50), jnp.float32)   # NCHW
    angles = jax.random.normal(ka, (B, 8), jnp.float32)          # 8 + 8 + 3 + 3 = 22
    ang_vel = jax.random.normal(kv, (B, 8), jnp.float32)
    base_pos = jax.random.normal(kp_, (B, 3), jnp.float32)
    base_orn = jax.random.normal(ko, (B, 3), jnp.float32)

    action = policy_forward(depth, angles, ang_vel, base_pos, base_orn, kparams)
    action = jax.block_until_ready(action)
    ref = reference_forward(depth, angles, ang_vel, base_pos, base_orn,
                            conv_w, conv_b, lin_w, lin_b)
    ref = jax.block_until_ready(ref)
    assert action.shape == (B, 4) and action.dtype == jnp.float32
    # bf16 depth inside the kernel vs f32 reference -> loosened tolerance.
    np.testing.assert_allclose(np.asarray(action), np.asarray(ref), rtol=1e-2, atol=1e-2)

    # Exercise the multi-step pipelined grid path (B=16 -> tb=8 -> grid of 2,
    # which also exercises the v7x 2-TensorCore split logic).
    B2 = 16
    k2 = jax.random.split(jax.random.PRNGKey(1), 5)
    depth2 = jax.random.normal(k2[0], (B2, 1, 50, 50), jnp.float32)
    angles2 = jax.random.normal(k2[1], (B2, 8), jnp.float32)
    ang_vel2 = jax.random.normal(k2[2], (B2, 8), jnp.float32)
    base_pos2 = jax.random.normal(k2[3], (B2, 3), jnp.float32)
    base_orn2 = jax.random.normal(k2[4], (B2, 3), jnp.float32)
    act2 = jax.block_until_ready(
        policy_forward(depth2, angles2, ang_vel2, base_pos2, base_orn2, kparams))
    ref2 = reference_forward(depth2, angles2, ang_vel2, base_pos2, base_orn2,
                             conv_w, conv_b, lin_w, lin_b)
    np.testing.assert_allclose(np.asarray(act2), np.asarray(ref2), rtol=1e-2, atol=1e-2)

    print("KERNEL_OK")
</pallas_src>

<mosaic_0001>
module attributes {stable_mosaic.version = 11 : i64} {
  func.func @policy_kernel(%arg0: i32, %arg1: memref<25x8x100xbf16, #tpu.memory_space<vmem>>, %arg2: memref<8x32xf32, #tpu.memory_space<vmem>>, %arg3: memref<2x25xf32, #tpu.memory_space<smem>>, %arg4: memref<2xf32, #tpu.memory_space<smem>>, %arg5: memref<2x100x4xf32, #tpu.memory_space<vmem>>, %arg6: memref<32x4xf32, #tpu.memory_space<vmem>>, %arg7: memref<8x4xf32, #tpu.memory_space<vmem>>) attributes {dimension_semantics = [#tpu.dimension_semantics<parallel>], iteration_bounds = array<i64: 1>, scalar_prefetch = 0 : i64, scratch_operands = 0 : i64, tpu.core_type = #tpu.core_type<tc>, window_params = [{transform_indices = @transform_0, window_bounds = array<i64: 25, 8, 100>}, {transform_indices = @transform_1, window_bounds = array<i64: 8, 32>}, {transform_indices = @transform_2, window_bounds = array<i64: 2, 25>}, {transform_indices = @transform_3, window_bounds = array<i64: 2>}, {pipeline_mode = #tpu.pipeline_mode<synchronous>, transform_indices = @transform_4, window_bounds = array<i64: 2, 100, 4>}, {pipeline_mode = #tpu.pipeline_mode<synchronous>, transform_indices = @transform_5, window_bounds = array<i64: 32, 4>}, {transform_indices = @transform_6, window_bounds = array<i64: 8, 4>}]} {
    %cst = arith.constant 0.000000e+00 : f32
    %0 = vector.broadcast %cst : f32 to vector<8x100xf32>
    %cst_0 = arith.constant 0.000000e+00 : f32
    %1 = vector.broadcast %cst_0 : f32 to vector<8x100xf32>
    %c0 = arith.constant 0 : index
    %c0_1 = arith.constant 0 : index
    %c0_2 = arith.constant 0 : index
    %2 = vector.load %arg1[%c0, %c0_1, %c0_2] : memref<25x8x100xbf16, #tpu.memory_space<vmem>>, vector<1x8x100xbf16>
    %3 = vector.shape_cast %2 : vector<1x8x100xbf16> to vector<8x100xbf16>
    %c0_3 = arith.constant 0 : index
    %c0_4 = arith.constant 0 : index
    %4 = memref.load %arg3[%c0_3, %c0_4] : memref<2x25xf32, #tpu.memory_space<smem>>
    %5 = arith.extf %3 : vector<8x100xbf16> to vector<8x100xf32>
    %6 = vector.broadcast %4 : f32 to vector<8x100xf32>
    %7 = arith.mulf %5, %6 : vector<8x100xf32>
    %8 = arith.addf %0, %7 : vector<8x100xf32>
    %c1 = arith.constant 1 : index
    %c0_5 = arith.constant 0 : index
    %9 = memref.load %arg3[%c1, %c0_5] : memref<2x25xf32, #tpu.memory_space<smem>>
    %10 = arith.extf %3 : vector<8x100xbf16> to vector<8x100xf32>
    %11 = vector.broadcast %9 : f32 to vector<8x100xf32>
    %12 = arith.mulf %10, %11 : vector<8x100xf32>
    %13 = arith.addf %1, %12 : vector<8x100xf32>
    %c1_6 = arith.constant 1 : index
    %c0_7 = arith.constant 0 : index
    %c0_8 = arith.constant 0 : index
    %14 = vector.load %arg1[%c1_6, %c0_7, %c0_8] : memref<25x8x100xbf16, #tpu.memory_space<vmem>>, vector<1x8x100xbf16>
    %15 = vector.shape_cast %14 : vector<1x8x100xbf16> to vector<8x100xbf16>
    %c0_9 = arith.constant 0 : index
    %c1_10 = arith.constant 1 : index
    %16 = memref.load %arg3[%c0_9, %c1_10] : memref<2x25xf32, #tpu.memory_space<smem>>
    %17 = arith.extf %15 : vector<8x100xbf16> to vector<8x100xf32>
    %18 = vector.broadcast %16 : f32 to vector<8x100xf32>
    %19 = arith.mulf %17, %18 : vector<8x100xf32>
    %20 = arith.addf %8, %19 : vector<8x100xf32>
    %c1_11 = arith.constant 1 : index
    %c1_12 = arith.constant 1 : index
    %21 = memref.load %arg3[%c1_11, %c1_12] : memref<2x25xf32, #tpu.memory_space<smem>>
    %22 = arith.extf %15 : vector<8x100xbf16> to vector<8x100xf32>
    %23 = vector.broadcast %21 : f32 to vector<8x100xf32>
    %24 = arith.mulf %22, %23 : vector<8x100xf32>
    %25 = arith.addf %13, %24 : vector<8x100xf32>
    %c2 = arith.constant 2 : index
    %c0_13 = arith.constant 0 : index
    %c0_14 = arith.constant 0 : index
    %26 = vector.load %arg1[%c2, %c0_13, %c0_14] : memref<25x8x100xbf16, #tpu.memory_space<vmem>>, vector<1x8x100xbf16>
    %27 = vector.shape_cast %26 : vector<1x8x100xbf16> to vector<8x100xbf16>
    %c0_15 = arith.constant 0 : index
    %c2_16 = arith.constant 2 : index
    %28 = memref.load %arg3[%c0_15, %c2_16] : memref<2x25xf32, #tpu.memory_space<smem>>
    %29 = arith.extf %27 : vector<8x100xbf16> to vector<8x100xf32>
    %30 = vector.broadcast %28 : f32 to vector<8x100xf32>
    %31 = arith.mulf %29, %30 : vector<8x100xf32>
    %32 = arith.addf %20, %31 : vector<8x100xf32>
    %c1_17 = arith.constant 1 : index
    %c2_18 = arith.constant 2 : index
    %33 = memref.load %arg3[%c1_17, %c2_18] : memref<2x25xf32, #tpu.memory_space<smem>>
    %34 = arith.extf %27 : vector<8x100xbf16> to vector<8x100xf32>
    %35 = vector.broadcast %33 : f32 to vector<8x100xf32>
    %36 = arith.mulf %34, %35 : vector<8x100xf32>
    %37 = arith.addf %25, %36 : vector<8x100xf32>
    %c3 = arith.constant 3 : index
    %c0_19 = arith.constant 0 : index
    %c0_20 = arith.constant 0 : index
    %38 = vector.load %arg1[%c3, %c0_19, %c0_20] : memref<25x8x100xbf16, #tpu.memory_space<vmem>>, vector<1x8x100xbf16>
    %39 = vector.shape_cast %38 : vector<1x8x100xbf16> to vector<8x100xbf16>
    %c0_21 = arith.constant 0 : index
    %c3_22 = arith.constant 3 : index
    %40 = memref.load %arg3[%c0_21, %c3_22] : memref<2x25xf32, #tpu.memory_space<smem>>
    %41 = arith.extf %39 : vector<8x100xbf16> to vector<8x100xf32>
    %42 = vector.broadcast %40 : f32 to vector<8x100xf32>
    %43 = arith.mulf %41, %42 : vector<8x100xf32>
    %44 = arith.addf %32, %43 : vector<8x100xf32>
    %c1_23 = arith.constant 1 : index
    %c3_24 = arith.constant 3 : index
    %45 = memref.load %arg3[%c1_23, %c3_24] : memref<2x25xf32, #tpu.memory_space<smem>>
    %46 = arith.extf %39 : vector<8x100xbf16> to vector<8x100xf32>
    %47 = vector.broadcast %45 : f32 to vector<8x100xf32>
    %48 = arith.mulf %46, %47 : vector<8x100xf32>
    %49 = arith.addf %37, %48 : vector<8x100xf32>
    %c4 = arith.constant 4 : index
    %c0_25 = arith.constant 0 : index
    %c0_26 = arith.constant 0 : index
    %50 = vector.load %arg1[%c4, %c0_25, %c0_26] : memref<25x8x100xbf16, #tpu.memory_space<vmem>>, vector<1x8x100xbf16>
    %51 = vector.shape_cast %50 : vector<1x8x100xbf16> to vector<8x100xbf16>
    %c0_27 = arith.constant 0 : index
    %c4_28 = arith.constant 4 : index
    %52 = memref.load %arg3[%c0_27, %c4_28] : memref<2x25xf32, #tpu.memory_space<smem>>
    %53 = arith.extf %51 : vector<8x100xbf16> to vector<8x100xf32>
    %54 = vector.broadcast %52 : f32 to vector<8x100xf32>
    %55 = arith.mulf %53, %54 : vector<8x100xf32>
    %56 = arith.addf %44, %55 : vector<8x100xf32>
    %c1_29 = arith.constant 1 : index
    %c4_30 = arith.constant 4 : index
    %57 = memref.load %arg3[%c1_29, %c4_30] : memref<2x25xf32, #tpu.memory_space<smem>>
    %58 = arith.extf %51 : vector<8x100xbf16> to vector<8x100xf32>
    %59 = vector.broadcast %57 : f32 to vector<8x100xf32>
    %60 = arith.mulf %58, %59 : vector<8x100xf32>
    %61 = arith.addf %49, %60 : vector<8x100xf32>
    %c5 = arith.constant 5 : index
    %c0_31 = arith.constant 0 : index
    %c0_32 = arith.constant 0 : index
    %62 = vector.load %arg1[%c5, %c0_31, %c0_32] : memref<25x8x100xbf16, #tpu.memory_space<vmem>>, vector<1x8x100xbf16>
    %63 = vector.shape_cast %62 : vector<1x8x100xbf16> to vector<8x100xbf16>
    %c0_33 = arith.constant 0 : index
    %c5_34 = arith.constant 5 : index
    %64 = memref.load %arg3[%c0_33, %c5_34] : memref<2x25xf32, #tpu.memory_space<smem>>
    %65 = arith.extf %63 : vector<8x100xbf16> to vector<8x100xf32>
    %66 = vector.broadcast %64 : f32 to vector<8x100xf32>
    %67 = arith.mulf %65, %66 : vector<8x100xf32>
    %68 = arith.addf %56, %67 : vector<8x100xf32>
    %c1_35 = arith.constant 1 : index
    %c5_36 = arith.constant 5 : index
    %69 = memref.load %arg3[%c1_35, %c5_36] : memref<2x25xf32, #tpu.memory_space<smem>>
    %70 = arith.extf %63 : vector<8x100xbf16> to vector<8x100xf32>
    %71 = vector.broadcast %69 : f32 to vector<8x100xf32>
    %72 = arith.mulf %70, %71 : vector<8x100xf32>
    %73 = arith.addf %61, %72 : vector<8x100xf32>
    %c6 = arith.constant 6 : index
    %c0_37 = arith.constant 0 : index
    %c0_38 = arith.constant 0 : index
    %74 = vector.load %arg1[%c6, %c0_37, %c0_38] : memref<25x8x100xbf16, #tpu.memory_space<vmem>>, vector<1x8x100xbf16>
    %75 = vector.shape_cast %74 : vector<1x8x100xbf16> to vector<8x100xbf16>
    %c0_39 = arith.constant 0 : index
    %c6_40 = arith.constant 6 : index
    %76 = memref.load %arg3[%c0_39, %c6_40] : memref<2x25xf32, #tpu.memory_space<smem>>
    %77 = arith.extf %75 : vector<8x100xbf16> to vector<8x100xf32>
    %78 = vector.broadcast %76 : f32 to vector<8x100xf32>
    %79 = arith.mulf %77, %78 : vector<8x100xf32>
    %80 = arith.addf %68, %79 : vector<8x100xf32>
    %c1_41 = arith.constant 1 : index
    %c6_42 = arith.constant 6 : index
    %81 = memref.load %arg3[%c1_41, %c6_42] : memref<2x25xf32, #tpu.memory_space<smem>>
    %82 = arith.extf %75 : vector<8x100xbf16> to vector<8x100xf32>
    %83 = vector.broadcast %81 : f32 to vector<8x100xf32>
    %84 = arith.mulf %82, %83 : vector<8x100xf32>
    %85 = arith.addf %73, %84 : vector<8x100xf32>
    %c7 = arith.constant 7 : index
    %c0_43 = arith.constant 0 : index
    %c0_44 = arith.constant 0 : index
    %86 = vector.load %arg1[%c7, %c0_43, %c0_44] : memref<25x8x100xbf16, #tpu.memory_space<vmem>>, vector<1x8x100xbf16>
    %87 = vector.shape_cast %86 : vector<1x8x100xbf16> to vector<8x100xbf16>
    %c0_45 = arith.constant 0 : index
    %c7_46 = arith.constant 7 : index
    %88 = memref.load %arg3[%c0_45, %c7_46] : memref<2x25xf32, #tpu.memory_space<smem>>
    %89 = arith.extf %87 : vector<8x100xbf16> to vector<8x100xf32>
    %90 = vector.broadcast %88 : f32 to vector<8x100xf32>
    %91 = arith.mulf %89, %90 : vector<8x100xf32>
    %92 = arith.addf %80, %91 : vector<8x100xf32>
    %c1_47 = arith.constant 1 : index
    %c7_48 = arith.constant 7 : index
    %93 = memref.load %arg3[%c1_47, %c7_48] : memref<2x25xf32, #tpu.memory_space<smem>>
    %94 = arith.extf %87 : vector<8x100xbf16> to vector<8x100xf32>
    %95 = vector.broadcast %93 : f32 to vector<8x100xf32>
    %96 = arith.mulf %94, %95 : vector<8x100xf32>
    %97 = arith.addf %85, %96 : vector<8x100xf32>
    %c8 = arith.constant 8 : index
    %c0_49 = arith.constant 0 : index
    %c0_50 = arith.constant 0 : index
    %98 = vector.load %arg1[%c8, %c0_49, %c0_50] : memref<25x8x100xbf16, #tpu.memory_space<vmem>>, vector<1x8x100xbf16>
    %99 = vector.shape_cast %98 : vector<1x8x100xbf16> to vector<8x100xbf16>
    %c0_51 = arith.constant 0 : index
    %c8_52 = arith.constant 8 : index
    %100 = memref.load %arg3[%c0_51, %c8_52] : memref<2x25xf32, #tpu.memory_space<smem>>
    %101 = arith.extf %99 : vector<8x100xbf16> to vector<8x100xf32>
    %102 = vector.broadcast %100 : f32 to vector<8x100xf32>
    %103 = arith.mulf %101, %102 : vector<8x100xf32>
    %104 = arith.addf %92, %103 : vector<8x100xf32>
    %c1_53 = arith.constant 1 : index
    %c8_54 = arith.constant 8 : index
    %105 = memref.load %arg3[%c1_53, %c8_54] : memref<2x25xf32, #tpu.memory_space<smem>>
    %106 = arith.extf %99 : vector<8x100xbf16> to vector<8x100xf32>
    %107 = vector.broadcast %105 : f32 to vector<8x100xf32>
    %108 = arith.mulf %106, %107 : vector<8x100xf32>
    %109 = arith.addf %97, %108 : vector<8x100xf32>
    %c9 = arith.constant 9 : index
    %c0_55 = arith.constant 0 : index
    %c0_56 = arith.constant 0 : index
    %110 = vector.load %arg1[%c9, %c0_55, %c0_56] : memref<25x8x100xbf16, #tpu.memory_space<vmem>>, vector<1x8x100xbf16>
    %111 = vector.shape_cast %110 : vector<1x8x100xbf16> to vector<8x100xbf16>
    %c0_57 = arith.constant 0 : index
    %c9_58 = arith.constant 9 : index
    %112 = memref.load %arg3[%c0_57, %c9_58] : memref<2x25xf32, #tpu.memory_space<smem>>
    %113 = arith.extf %111 : vector<8x100xbf16> to vector<8x100xf32>
    %114 = vector.broadcast %112 : f32 to vector<8x100xf32>
    %115 = arith.mulf %113, %114 : vector<8x100xf32>
    %116 = arith.addf %104, %115 : vector<8x100xf32>
    %c1_59 = arith.constant 1 : index
    %c9_60 = arith.constant 9 : index
    %117 = memref.load %arg3[%c1_59, %c9_60] : memref<2x25xf32, #tpu.memory_space<smem>>
    %118 = arith.extf %111 : vector<8x100xbf16> to vector<8x100xf32>
    %119 = vector.broadcast %117 : f32 to vector<8x100xf32>
    %120 = arith.mulf %118, %119 : vector<8x100xf32>
    %121 = arith.addf %109, %120 : vector<8x100xf32>
    %c10 = arith.constant 10 : index
    %c0_61 = arith.constant 0 : index
    %c0_62 = arith.constant 0 : index
    %122 = vector.load %arg1[%c10, %c0_61, %c0_62] : memref<25x8x100xbf16, #tpu.memory_space<vmem>>, vector<1x8x100xbf16>
    %123 = vector.shape_cast %122 : vector<1x8x100xbf16> to vector<8x100xbf16>
    %c0_63 = arith.constant 0 : index
    %c10_64 = arith.constant 10 : index
    %124 = memref.load %arg3[%c0_63, %c10_64] : memref<2x25xf32, #tpu.memory_space<smem>>
    %125 = arith.extf %123 : vector<8x100xbf16> to vector<8x100xf32>
    %126 = vector.broadcast %124 : f32 to vector<8x100xf32>
    %127 = arith.mulf %125, %126 : vector<8x100xf32>
    %128 = arith.addf %116, %127 : vector<8x100xf32>
    %c1_65 = arith.constant 1 : index
    %c10_66 = arith.constant 10 : index
    %129 = memref.load %arg3[%c1_65, %c10_66] : memref<2x25xf32, #tpu.memory_space<smem>>
    %130 = arith.extf %123 : vector<8x100xbf16> to vector<8x100xf32>
    %131 = vector.broadcast %129 : f32 to vector<8x100xf32>
    %132 = arith.mulf %130, %131 : vector<8x100xf32>
    %133 = arith.addf %121, %132 : vector<8x100xf32>
    %c11 = arith.constant 11 : index
    %c0_67 = arith.constant 0 : index
    %c0_68 = arith.constant 0 : index
    %134 = vector.load %arg1[%c11, %c0_67, %c0_68] : memref<25x8x100xbf16, #tpu.memory_space<vmem>>, vector<1x8x100xbf16>
    %135 = vector.shape_cast %134 : vector<1x8x100xbf16> to vector<8x100xbf16>
    %c0_69 = arith.constant 0 : index
    %c11_70 = arith.constant 11 : index
    %136 = memref.load %arg3[%c0_69, %c11_70] : memref<2x25xf32, #tpu.memory_space<smem>>
    %137 = arith.extf %135 : vector<8x100xbf16> to vector<8x100xf32>
    %138 = vector.broadcast %136 : f32 to vector<8x100xf32>
    %139 = arith.mulf %137, %138 : vector<8x100xf32>
    %140 = arith.addf %128, %139 : vector<8x100xf32>
    %c1_71 = arith.constant 1 : index
    %c11_72 = arith.constant 11 : index
    %141 = memref.load %arg3[%c1_71, %c11_72] : memref<2x25xf32, #tpu.memory_space<smem>>
    %142 = arith.extf %135 : vector<8x100xbf16> to vector<8x100xf32>
    %143 = vector.broadcast %141 : f32 to vector<8x100xf32>
    %144 = arith.mulf %142, %143 : vector<8x100xf32>
    %145 = arith.addf %133, %144 : vector<8x100xf32>
    %c12 = arith.constant 12 : index
    %c0_73 = arith.constant 0 : index
    %c0_74 = arith.constant 0 : index
    %146 = vector.load %arg1[%c12, %c0_73, %c0_74] : memref<25x8x100xbf16, #tpu.memory_space<vmem>>, vector<1x8x100xbf16>
    %147 = vector.shape_cast %146 : vector<1x8x100xbf16> to vector<8x100xbf16>
    %c0_75 = arith.constant 0 : index
    %c12_76 = arith.constant 12 : index
    %148 = memref.load %arg3[%c0_75, %c12_76] : memref<2x25xf32, #tpu.memory_space<smem>>
    %149 = arith.extf %147 : vector<8x100xbf16> to vector<8x100xf32>
    %150 = vector.broadcast %148 : f32 to vector<8x100xf32>
    %151 = arith.mulf %149, %150 : vector<8x100xf32>
    %152 = arith.addf %140, %151 : vector<8x100xf32>
    %c1_77 = arith.constant 1 : index
    %c12_78 = arith.constant 12 : index
    %153 = memref.load %arg3[%c1_77, %c12_78] : memref<2x25xf32, #tpu.memory_space<smem>>
    %154 = arith.extf %147 : vector<8x100xbf16> to vector<8x100xf32>
    %155 = vector.broadcast %153 : f32 to vector<8x100xf32>
    %156 = arith.mulf %154, %155 : vector<8x100xf32>
    %157 = arith.addf %145, %156 : vector<8x100xf32>
    %c13 = arith.constant 13 : index
    %c0_79 = arith.constant 0 : index
    %c0_80 = arith.constant 0 : index
    %158 = vector.load %arg1[%c13, %c0_79, %c0_80] : memref<25x8x100xbf16, #tpu.memory_space<vmem>>, vector<1x8x100xbf16>
    %159 = vector.shape_cast %158 : vector<1x8x100xbf16> to vector<8x100xbf16>
    %c0_81 = arith.constant 0 : index
    %c13_82 = arith.constant 13 : index
    %160 = memref.load %arg3[%c0_81, %c13_82] : memref<2x25xf32, #tpu.memory_space<smem>>
    %161 = arith.extf %159 : vector<8x100xbf16> to vector<8x100xf32>
    %162 = vector.broadcast %160 : f32 to vector<8x100xf32>
    %163 = arith.mulf %161, %162 : vector<8x100xf32>
    %164 = arith.addf %152, %163 : vector<8x100xf32>
    %c1_83 = arith.constant 1 : index
    %c13_84 = arith.constant 13 : index
    %165 = memref.load %arg3[%c1_83, %c13_84] : memref<2x25xf32, #tpu.memory_space<smem>>
    %166 = arith.extf %159 : vector<8x100xbf16> to vector<8x100xf32>
    %167 = vector.broadcast %165 : f32 to vector<8x100xf32>
    %168 = arith.mulf %166, %167 : vector<8x100xf32>
    %169 = arith.addf %157, %168 : vector<8x100xf32>
    %c14 = arith.constant 14 : index
    %c0_85 = arith.constant 0 : index
    %c0_86 = arith.constant 0 : index
    %170 = vector.load %arg1[%c14, %c0_85, %c0_86] : memref<25x8x100xbf16, #tpu.memory_space<vmem>>, vector<1x8x100xbf16>
    %171 = vector.shape_cast %170 : vector<1x8x100xbf16> to vector<8x100xbf16>
    %c0_87 = arith.constant 0 : index
    %c14_88 = arith.constant 14 : index
    %172 = memref.load %arg3[%c0_87, %c14_88] : memref<2x25xf32, #tpu.memory_space<smem>>
    %173 = arith.extf %171 : vector<8x100xbf16> to vector<8x100xf32>
    %174 = vector.broadcast %172 : f32 to vector<8x100xf32>
    %175 = arith.mulf %173, %174 : vector<8x100xf32>
    %176 = arith.addf %164, %175 : vector<8x100xf32>
    %c1_89 = arith.constant 1 : index
    %c14_90 = arith.constant 14 : index
    %177 = memref.load %arg3[%c1_89, %c14_90] : memref<2x25xf32, #tpu.memory_space<smem>>
    %178 = arith.extf %171 : vector<8x100xbf16> to vector<8x100xf32>
    %179 = vector.broadcast %177 : f32 to vector<8x100xf32>
    %180 = arith.mulf %178, %179 : vector<8x100xf32>
    %181 = arith.addf %169, %180 : vector<8x100xf32>
    %c15 = arith.constant 15 : index
    %c0_91 = arith.constant 0 : index
    %c0_92 = arith.constant 0 : index
    %182 = vector.load %arg1[%c15, %c0_91, %c0_92] : memref<25x8x100xbf16, #tpu.memory_space<vmem>>, vector<1x8x100xbf16>
    %183 = vector.shape_cast %182 : vector<1x8x100xbf16> to vector<8x100xbf16>
    %c0_93 = arith.constant 0 : index
    %c15_94 = arith.constant 15 : index
    %184 = memref.load %arg3[%c0_93, %c15_94] : memref<2x25xf32, #tpu.memory_space<smem>>
    %185 = arith.extf %183 : vector<8x100xbf16> to vector<8x100xf32>
    %186 = vector.broadcast %184 : f32 to vector<8x100xf32>
    %187 = arith.mulf %185, %186 : vector<8x100xf32>
    %188 = arith.addf %176, %187 : vector<8x100xf32>
    %c1_95 = arith.constant 1 : index
    %c15_96 = arith.constant 15 : index
    %189 = memref.load %arg3[%c1_95, %c15_96] : memref<2x25xf32, #tpu.memory_space<smem>>
    %190 = arith.extf %183 : vector<8x100xbf16> to vector<8x100xf32>
    %191 = vector.broadcast %189 : f32 to vector<8x100xf32>
    %192 = arith.mulf %190, %191 : vector<8x100xf32>
    %193 = arith.addf %181, %192 : vector<8x100xf32>
    %c16 = arith.constant 16 : index
    %c0_97 = arith.constant 0 : index
    %c0_98 = arith.constant 0 : index
    %194 = vector.load %arg1[%c16, %c0_97, %c0_98] : memref<25x8x100xbf16, #tpu.memory_space<vmem>>, vector<1x8x100xbf16>
    %195 = vector.shape_cast %194 : vector<1x8x100xbf16> to vector<8x100xbf16>
    %c0_99 = arith.constant 0 : index
    %c16_100 = arith.constant 16 : index
    %196 = memref.load %arg3[%c0_99, %c16_100] : memref<2x25xf32, #tpu.memory_space<smem>>
    %197 = arith.extf %195 : vector<8x100xbf16> to vector<8x100xf32>
    %198 = vector.broadcast %196 : f32 to vector<8x100xf32>
    %199 = arith.mulf %197, %198 : vector<8x100xf32>
    %200 = arith.addf %188, %199 : vector<8x100xf32>
    %c1_101 = arith.constant 1 : index
    %c16_102 = arith.constant 16 : index
    %201 = memref.load %arg3[%c1_101, %c16_102] : memref<2x25xf32, #tpu.memory_space<smem>>
    %202 = arith.extf %195 : vector<8x100xbf16> to vector<8x100xf32>
    %203 = vector.broadcast %201 : f32 to vector<8x100xf32>
    %204 = arith.mulf %202, %203 : vector<8x100xf32>
    %205 = arith.addf %193, %204 : vector<8x100xf32>
    %c17 = arith.constant 17 : index
    %c0_103 = arith.constant 0 : index
    %c0_104 = arith.constant 0 : index
    %206 = vector.load %arg1[%c17, %c0_103, %c0_104] : memref<25x8x100xbf16, #tpu.memory_space<vmem>>, vector<1x8x100xbf16>
    %207 = vector.shape_cast %206 : vector<1x8x100xbf16> to vector<8x100xbf16>
    %c0_105 = arith.constant 0 : index
    %c17_106 = arith.constant 17 : index
    %208 = memref.load %arg3[%c0_105, %c17_106] : memref<2x25xf32, #tpu.memory_space<smem>>
    %209 = arith.extf %207 : vector<8x100xbf16> to vector<8x100xf32>
    %210 = vector.broadcast %208 : f32 to vector<8x100xf32>
    %211 = arith.mulf %209, %210 : vector<8x100xf32>
    %212 = arith.addf %200, %211 : vector<8x100xf32>
    %c1_107 = arith.constant 1 : index
    %c17_108 = arith.constant 17 : index
    %213 = memref.load %arg3[%c1_107, %c17_108] : memref<2x25xf32, #tpu.memory_space<smem>>
    %214 = arith.extf %207 : vector<8x100xbf16> to vector<8x100xf32>
    %215 = vector.broadcast %213 : f32 to vector<8x100xf32>
    %216 = arith.mulf %214, %215 : vector<8x100xf32>
    %217 = arith.addf %205, %216 : vector<8x100xf32>
    %c18 = arith.constant 18 : index
    %c0_109 = arith.constant 0 : index
    %c0_110 = arith.constant 0 : index
    %218 = vector.load %arg1[%c18, %c0_109, %c0_110] : memref<25x8x100xbf16, #tpu.memory_space<vmem>>, vector<1x8x100xbf16>
    %219 = vector.shape_cast %218 : vector<1x8x100xbf16> to vector<8x100xbf16>
    %c0_111 = arith.constant 0 : index
    %c18_112 = arith.constant 18 : index
    %220 = memref.load %arg3[%c0_111, %c18_112] : memref<2x25xf32, #tpu.memory_space<smem>>
    %221 = arith.extf %219 : vector<8x100xbf16> to vector<8x100xf32>
    %222 = vector.broadcast %220 : f32 to vector<8x100xf32>
    %223 = arith.mulf %221, %222 : vector<8x100xf32>
    %224 = arith.addf %212, %223 : vector<8x100xf32>
    %c1_113 = arith.constant 1 : index
    %c18_114 = arith.constant 18 : index
    %225 = memref.load %arg3[%c1_113, %c18_114] : memref<2x25xf32, #tpu.memory_space<smem>>
    %226 = arith.extf %219 : vector<8x100xbf16> to vector<8x100xf32>
    %227 = vector.broadcast %225 : f32 to vector<8x100xf32>
    %228 = arith.mulf %226, %227 : vector<8x100xf32>
    %229 = arith.addf %217, %228 : vector<8x100xf32>
    %c19 = arith.constant 19 : index
    %c0_115 = arith.constant 0 : index
    %c0_116 = arith.constant 0 : index
    %230 = vector.load %arg1[%c19, %c0_115, %c0_116] : memref<25x8x100xbf16, #tpu.memory_space<vmem>>, vector<1x8x100xbf16>
    %231 = vector.shape_cast %230 : vector<1x8x100xbf16> to vector<8x100xbf16>
    %c0_117 = arith.constant 0 : index
    %c19_118 = arith.constant 19 : index
    %232 = memref.load %arg3[%c0_117, %c19_118] : memref<2x25xf32, #tpu.memory_space<smem>>
    %233 = arith.extf %231 : vector<8x100xbf16> to vector<8x100xf32>
    %234 = vector.broadcast %232 : f32 to vector<8x100xf32>
    %235 = arith.mulf %233, %234 : vector<8x100xf32>
    %236 = arith.addf %224, %235 : vector<8x100xf32>
    %c1_119 = arith.constant 1 : index
    %c19_120 = arith.constant 19 : index
    %237 = memref.load %arg3[%c1_119, %c19_120] : memref<2x25xf32, #tpu.memory_space<smem>>
    %238 = arith.extf %231 : vector<8x100xbf16> to vector<8x100xf32>
    %239 = vector.broadcast %237 : f32 to vector<8x100xf32>
    %240 = arith.mulf %238, %239 : vector<8x100xf32>
    %241 = arith.addf %229, %240 : vector<8x100xf32>
    %c20 = arith.constant 20 : index
    %c0_121 = arith.constant 0 : index
    %c0_122 = arith.constant 0 : index
    %242 = vector.load %arg1[%c20, %c0_121, %c0_122] : memref<25x8x100xbf16, #tpu.memory_space<vmem>>, vector<1x8x100xbf16>
    %243 = vector.shape_cast %242 : vector<1x8x100xbf16> to vector<8x100xbf16>
    %c0_123 = arith.constant 0 : index
    %c20_124 = arith.constant 20 : index
    %244 = memref.load %arg3[%c0_123, %c20_124] : memref<2x25xf32, #tpu.memory_space<smem>>
    %245 = arith.extf %243 : vector<8x100xbf16> to vector<8x100xf32>
    %246 = vector.broadcast %244 : f32 to vector<8x100xf32>
    %247 = arith.mulf %245, %246 : vector<8x100xf32>
    %248 = arith.addf %236, %247 : vector<8x100xf32>
    %c1_125 = arith.constant 1 : index
    %c20_126 = arith.constant 20 : index
    %249 = memref.load %arg3[%c1_125, %c20_126] : memref<2x25xf32, #tpu.memory_space<smem>>
    %250 = arith.extf %243 : vector<8x100xbf16> to vector<8x100xf32>
    %251 = vector.broadcast %249 : f32 to vector<8x100xf32>
    %252 = arith.mulf %250, %251 : vector<8x100xf32>
    %253 = arith.addf %241, %252 : vector<8x100xf32>
    %c21 = arith.constant 21 : index
    %c0_127 = arith.constant 0 : index
    %c0_128 = arith.constant 0 : index
    %254 = vector.load %arg1[%c21, %c0_127, %c0_128] : memref<25x8x100xbf16, #tpu.memory_space<vmem>>, vector<1x8x100xbf16>
    %255 = vector.shape_cast %254 : vector<1x8x100xbf16> to vector<8x100xbf16>
    %c0_129 = arith.constant 0 : index
    %c21_130 = arith.constant 21 : index
    %256 = memref.load %arg3[%c0_129, %c21_130] : memref<2x25xf32, #tpu.memory_space<smem>>
    %257 = arith.extf %255 : vector<8x100xbf16> to vector<8x100xf32>
    %258 = vector.broadcast %256 : f32 to vector<8x100xf32>
    %259 = arith.mulf %257, %258 : vector<8x100xf32>
    %260 = arith.addf %248, %259 : vector<8x100xf32>
    %c1_131 = arith.constant 1 : index
    %c21_132 = arith.constant 21 : index
    %261 = memref.load %arg3[%c1_131, %c21_132] : memref<2x25xf32, #tpu.memory_space<smem>>
    %262 = arith.extf %255 : vector<8x100xbf16> to vector<8x100xf32>
    %263 = vector.broadcast %261 : f32 to vector<8x100xf32>
    %264 = arith.mulf %262, %263 : vector<8x100xf32>
    %265 = arith.addf %253, %264 : vector<8x100xf32>
    %c22 = arith.constant 22 : index
    %c0_133 = arith.constant 0 : index
    %c0_134 = arith.constant 0 : index
    %266 = vector.load %arg1[%c22, %c0_133, %c0_134] : memref<25x8x100xbf16, #tpu.memory_space<vmem>>, vector<1x8x100xbf16>
    %267 = vector.shape_cast %266 : vector<1x8x100xbf16> to vector<8x100xbf16>
    %c0_135 = arith.constant 0 : index
    %c22_136 = arith.constant 22 : index
    %268 = memref.load %arg3[%c0_135, %c22_136] : memref<2x25xf32, #tpu.memory_space<smem>>
    %269 = arith.extf %267 : vector<8x100xbf16> to vector<8x100xf32>
    %270 = vector.broadcast %268 : f32 to vector<8x100xf32>
    %271 = arith.mulf %269, %270 : vector<8x100xf32>
    %272 = arith.addf %260, %271 : vector<8x100xf32>
    %c1_137 = arith.constant 1 : index
    %c22_138 = arith.constant 22 : index
    %273 = memref.load %arg3[%c1_137, %c22_138] : memref<2x25xf32, #tpu.memory_space<smem>>
    %274 = arith.extf %267 : vector<8x100xbf16> to vector<8x100xf32>
    %275 = vector.broadcast %273 : f32 to vector<8x100xf32>
    %276 = arith.mulf %274, %275 : vector<8x100xf32>
    %277 = arith.addf %265, %276 : vector<8x100xf32>
    %c23 = arith.constant 23 : index
    %c0_139 = arith.constant 0 : index
    %c0_140 = arith.constant 0 : index
    %278 = vector.load %arg1[%c23, %c0_139, %c0_140] : memref<25x8x100xbf16, #tpu.memory_space<vmem>>, vector<1x8x100xbf16>
    %279 = vector.shape_cast %278 : vector<1x8x100xbf16> to vector<8x100xbf16>
    %c0_141 = arith.constant 0 : index
    %c23_142 = arith.constant 23 : index
    %280 = memref.load %arg3[%c0_141, %c23_142] : memref<2x25xf32, #tpu.memory_space<smem>>
    %281 = arith.extf %279 : vector<8x100xbf16> to vector<8x100xf32>
    %282 = vector.broadcast %280 : f32 to vector<8x100xf32>
    %283 = arith.mulf %281, %282 : vector<8x100xf32>
    %284 = arith.addf %272, %283 : vector<8x100xf32>
    %c1_143 = arith.constant 1 : index
    %c23_144 = arith.constant 23 : index
    %285 = memref.load %arg3[%c1_143, %c23_144] : memref<2x25xf32, #tpu.memory_space<smem>>
    %286 = arith.extf %279 : vector<8x100xbf16> to vector<8x100xf32>
    %287 = vector.broadcast %285 : f32 to vector<8x100xf32>
    %288 = arith.mulf %286, %287 : vector<8x100xf32>
    %289 = arith.addf %277, %288 : vector<8x100xf32>
    %c24 = arith.constant 24 : index
    %c0_145 = arith.constant 0 : index
    %c0_146 = arith.constant 0 : index
    %290 = vector.load %arg1[%c24, %c0_145, %c0_146] : memref<25x8x100xbf16, #tpu.memory_space<vmem>>, vector<1x8x100xbf16>
    %291 = vector.shape_cast %290 : vector<1x8x100xbf16> to vector<8x100xbf16>
    %c0_147 = arith.constant 0 : index
    %c24_148 = arith.constant 24 : index
    %292 = memref.load %arg3[%c0_147, %c24_148] : memref<2x25xf32, #tpu.memory_space<smem>>
    %293 = arith.extf %291 : vector<8x100xbf16> to vector<8x100xf32>
    %294 = vector.broadcast %292 : f32 to vector<8x100xf32>
    %295 = arith.mulf %293, %294 : vector<8x100xf32>
    %296 = arith.addf %284, %295 : vector<8x100xf32>
    %c1_149 = arith.constant 1 : index
    %c24_150 = arith.constant 24 : index
    %297 = memref.load %arg3[%c1_149, %c24_150] : memref<2x25xf32, #tpu.memory_space<smem>>
    %298 = arith.extf %291 : vector<8x100xbf16> to vector<8x100xf32>
    %299 = vector.broadcast %297 : f32 to vector<8x100xf32>
    %300 = arith.mulf %298, %299 : vector<8x100xf32>
    %301 = arith.addf %289, %300 : vector<8x100xf32>
    %c0_151 = arith.constant 0 : index
    %302 = memref.load %arg4[%c0_151] : memref<2xf32, #tpu.memory_space<smem>>
    %303 = vector.broadcast %302 : f32 to vector<8x100xf32>
    %304 = arith.addf %296, %303 : vector<8x100xf32>
    %305 = math.tanh %304 : vector<8x100xf32>
    %c1_152 = arith.constant 1 : index
    %306 = memref.load %arg4[%c1_152] : memref<2xf32, #tpu.memory_space<smem>>
    %307 = vector.broadcast %306 : f32 to vector<8x100xf32>
    %308 = arith.addf %301, %307 : vector<8x100xf32>
    %309 = math.tanh %308 : vector<8x100xf32>
    %c0_153 = arith.constant 0 : index
    %c0_154 = arith.constant 0 : index
    %c0_155 = arith.constant 0 : index
    %310 = vector.load %arg5[%c0_153, %c0_154, %c0_155] : memref<2x100x4xf32, #tpu.memory_space<vmem>>, vector<1x100x4xf32>
    %311 = vector.shape_cast %310 : vector<1x100x4xf32> to vector<100x4xf32>
    %cst_156 = arith.constant dense<0.000000e+00> : vector<8x4xf32>
    %312 = tpu.matmul %305, %311, %cst_156 {dimension_numbers = #tpu.dot_dimension_numbers<[1], [0], [0], [1], [0, 0, 1, 1], [], []>} : vector<8x100xf32>, vector<100x4xf32>, vector<8x4xf32> -> vector<8x4xf32>
    %c1_157 = arith.constant 1 : index
    %c0_158 = arith.constant 0 : index
    %c0_159 = arith.constant 0 : index
    %313 = vector.load %arg5[%c1_157, %c0_158, %c0_159] : memref<2x100x4xf32, #tpu.memory_space<vmem>>, vector<1x100x4xf32>
    %314 = vector.shape_cast %313 : vector<1x100x4xf32> to vector<100x4xf32>
    %cst_160 = arith.constant dense<0.000000e+00> : vector<8x4xf32>
    %315 = tpu.matmul %309, %314, %cst_160 {dimension_numbers = #tpu.dot_dimension_numbers<[1], [0], [0], [1], [0, 0, 1, 1], [], []>} : vector<8x100xf32>, vector<100x4xf32>, vector<8x4xf32> -> vector<8x4xf32>
    %316 = arith.addf %312, %315 : vector<8x4xf32>
    %c0_161 = arith.constant 0 : index
    %c0_162 = arith.constant 0 : index
    %317 = vector.load %arg2[%c0_161, %c0_162] : memref<8x32xf32, #tpu.memory_space<vmem>>, vector<8x32xf32>
    %c0_163 = arith.constant 0 : index
    %c0_164 = arith.constant 0 : index
    %318 = vector.load %arg6[%c0_163, %c0_164] : memref<32x4xf32, #tpu.memory_space<vmem>>, vector<32x4xf32>
    %cst_165 = arith.constant dense<0.000000e+00> : vector<8x4xf32>
    %319 = tpu.matmul %317, %318, %cst_165 {dimension_numbers = #tpu.dot_dimension_numbers<[1], [0], [0], [1], [0, 0, 1, 1], [], []>} : vector<8x32xf32>, vector<32x4xf32>, vector<8x4xf32> -> vector<8x4xf32>
    %320 = arith.addf %316, %319 : vector<8x4xf32>
    %321 = arith.negf %320 : vector<8x4xf32>
    %322 = math.exp %321 : vector<8x4xf32>
    %cst_166 = arith.constant 1.000000e+00 : f32
    %323 = vector.broadcast %cst_166 : f32 to vector<8x4xf32>
    %324 = arith.addf %323, %322 : vector<8x4xf32>
    %325 = arith.divf %323, %324 : vector<8x4xf32>
    %c0_167 = arith.constant 0 : index
    %c0_168 = arith.constant 0 : index
    %326 = vector.load %arg7[%c0_167, %c0_168] : memref<8x4xf32, #tpu.memory_space<vmem>>, vector<8x4xf32>
    tpu.vector_store %arg7[%c0_167, %c0_168], %325 {strides = array<i32>} : memref<8x4xf32, #tpu.memory_space<vmem>>, vector<8x4xf32>,
    return
  }
  func.func @transform_0(%arg0: i32) -> (i32, i32, i32) {
    %c0_i32 = arith.constant 0 : i32
    %c0_i32_0 = arith.constant 0 : i32
    %c0_i32_1 = arith.constant 0 : i32
    return %c0_i32, %arg0, %c0_i32_0 : i32, i32, i32
  }
  func.func @transform_1(%arg0: i32) -> (i32, i32) {
    %c0_i32 = arith.constant 0 : i32
    %c0_i32_0 = arith.constant 0 : i32
    return %arg0, %c0_i32 : i32, i32
  }
  func.func @transform_2(%arg0: i32) -> (i32, i32) {
    %c0_i32 = arith.constant 0 : i32
    %c0_i32_0 = arith.constant 0 : i32
    %c0_i32_1 = arith.constant 0 : i32
    return %c0_i32, %c0_i32_0 : i32, i32
  }
  func.func @transform_3(%arg0: i32) -> i32 {
    %c0_i32 = arith.constant 0 : i32
    %c0_i32_0 = arith.constant 0 : i32
    return %c0_i32 : i32
  }
  func.func @transform_4(%arg0: i32) -> (i32, i32, i32) {
    %c0_i32 = arith.constant 0 : i32
    %c0_i32_0 = arith.constant 0 : i32
    %c0_i32_1 = arith.constant 0 : i32
    %c0_i32_2 = arith.constant 0 : i32
    return %c0_i32, %c0_i32_0, %c0_i32_1 : i32, i32, i32
  }
  func.func @transform_5(%arg0: i32) -> (i32, i32) {
    %c0_i32 = arith.constant 0 : i32
    %c0_i32_0 = arith.constant 0 : i32
    %c0_i32_1 = arith.constant 0 : i32
    return %c0_i32, %c0_i32_0 : i32, i32
  }
  func.func @transform_6(%arg0: i32) -> (i32, i32) {
    %c0_i32 = arith.constant 0 : i32
    %c0_i32_0 = arith.constant 0 : i32
    return %arg0, %c0_i32 : i32, i32
  }
}

</mosaic_0001>

<bundles_post_ra>
// kernel: policy_forward.1
= control target key start
LH: loop header
LB: loop body
LE: loop exit
PB: predicated region body
PF: predicated region fallthrough
CT: control target
= control target key end

     0   :  { %11 = vsyncpa [#allocation3], 0  ;;  %s1329_s0 = inlined_call_operand.vmem [shape: bf16[25,8,100], index: 0, kind: input, shape index: {}]   ;;  %s1330_s1 = inlined_call_operand.vmem [shape: f32[8,32], index: 1, kind: input, shape index: {}]   ;;  %s1331_s2 = inlined_call_operand.vmem [shape: f32[2,25], index: 2, kind: input, shape index: {}]   ;;  %s1332_s3 = inlined_call_operand.vmem [shape: f32[2], index: 3, kind: input, shape index: {}]   ;;  %s1333_s4 = inlined_call_operand.vmem [shape: f32[2,100,4], index: 4, kind: input, shape index: {}]   ;;  %s1334_s5 = inlined_call_operand.vmem [shape: f32[32,4], index: 5, kind: input, shape index: {}]   ;;  %s1335_s6 = inlined_call_operand.vmem [shape: f32[8,4], index: 6, kind: output, shape index: {}]  }
   0x1   :  { %s23_s23 = sshll.u32 %s1331_s2, 4  ;;  %s24_s23 = int_to_ptr.vmem [resolvable:$true] %s23_s23 }
   0x2   :  { %12 = vsyncpa [#allocation5], 0  ;;  %s33_s26 = sshll.u32 %s1332_s3, 4  ;;  %s812_s27 = scalar_lea.vmem %s24_s23, 32  ;;  %s34_s26 = int_to_ptr.vmem [resolvable:$true] %s33_s26 }
   0x3   :  { %p813_p0 = scmp.ne.s32.totalorder %s24_s23, %s812_s27  ;;  %p817_p1 = scmp.lt.s32.totalorder %s24_s23, %s24_s23 }
   0x4   :  { %p818_p2 = scmp.lt.s32.totalorder %s812_s27, %s812_s27 }
   0x6   :  { %p819_p3 = por %p818_p2, %p817_p1 }
   0x8   :  { %p820_p4 = pnand %p819_p3, %p813_p0 }
   0xa   :  { %823 = shalt.err (!%p820_p4)
}
   0xb   :  { %s840_s28 = smov [#allocation2]   ;;  %s824_s29 = scalar_lea.vmem %s34_s26, 16 }
   0xc   :  { %26 = dma.vmem_to_smem %s24_s23, 32, %s840_s28, [#allocation3]  }
   0xd   :  { %p825_p5 = scmp.ne.s32.totalorder %s34_s26, %s824_s29  ;;  %p829_p6 = scmp.lt.s32.totalorder %s34_s26, %s34_s26 }
   0xe   :  { %p830_p7 = scmp.lt.s32.totalorder %s824_s29, %s824_s29 }
  0x10   :  { %p831_p8 = por %p830_p7, %p829_p6 }
  0x12   :  { %p832_p9 = pnand %p831_p8, %p825_p5 }
  0x14   :  { %835 = shalt.err (!%p832_p9)
}
  0x15   :  { %s841_s2 = smov [#allocation4]  }
  0x16   :  { %36 = dma.vmem_to_smem %s34_s26, 16, %s841_s2, [#allocation5]  }
  0x17   :  { %836 = dma.done.wait [#allocation3], 32  }
  0x18   :  { %837 = vsyncadd [#allocation3], 4294967264 }
  0x19   :  { %838 = dma.done.wait [#allocation5], 16  }
  0x1a   :  { %839 = vsyncadd [#allocation5], 4294967280 }
  0x1b   :  { %47 = sfence }
  0x1c   :  { %v691_v0 = vld [vmem:[%s1333_s4 + $0xc8] sm:$0xf]  ;;  %vm361_vm0 = vcmask 1043456   ;;  %v342_v1 = vld [vmem:[%s1333_s4 + $0x60] sm:$0xf]  ;;  %v842_v2 = vmov 0.0  }
  0x1d   :  { %731 = vmatprep.subr.mxu0 %v842_v2  ;;  %760 = vmatprep.subr.mxu1 %v842_v2  ;;  %v690_v3 = vld [vmem:[%s1333_s4 + $0xc0] sm:$0xff]  ;;  %v341_v4 = vld [vmem:[%s1333_s4 + $0x58] sm:$0xff]  ;;  %s899_s13 = sld [smem:[#allocation2 + $0x80]]  ;;  %v340_v6 = vld [vmem:[%s1333_s4 + $0x50] sm:$0xff]  ;;  %vm843_vm1 = vmmov 0   ;;  %vm357_vm2 = vcmask 818176  }
  0x1e   :  { %732 = vmatpush3.msk.msra.mxu0 %vm361_vm0, %v691_v0  ;;  %761 = vmatpush3.msk.msra.mxu1 %vm361_vm0, %v342_v1  ;;  %s901_s14 = sld [smem:[#allocation2 + $0x81]]  ;;  %v689_v5 = vld [vmem:[%s1333_s4 + $0xb8] sm:$0xff]  ;;  %v688_v7 = vld [vmem:[%s1333_s4 + $0xb0] sm:$0xff]  ;;  %v339_v8 = vld [vmem:[%s1333_s4 + $0x48] sm:$0xff]  ;;  %vm516_vm3 = vcmask 261120   ;;  %vm597_vm4 = vcmask 31744  }
  0x1f   :  { %733 = vmatprep.subr.mxu0 %v842_v2  ;;  %762 = vmatprep.subr.mxu1 %v842_v2  ;;  %s911_s19 = sld [smem:[#allocation2 + $0x82]]  ;;  %v687_v9 = vld [vmem:[%s1333_s4 + $0xa8] sm:$0xff]  ;;  %v338_v10 = vld [vmem:[%s1333_s4 + $0x40] sm:$0xff]  ;;  %v337_v12 = vld [vmem:[%s1333_s4 + $0x38] sm:$0xff] }
  0x20   :  { %734 = vmatpush3.msra.mxu0 %v690_v3  ;;  %763 = vmatpush3.msra.mxu1 %v341_v4  ;;  %s913_s20 = sld [smem:[#allocation2 + $0x83]]  ;;  %v686_v11 = vld [vmem:[%s1333_s4 + $0xa0] sm:$0xff]  ;;  %v953_v16 = vld [vmem:[%s1329_s0 + $0x8] sm:$0xff]   ;;  %v959_v18 = vld [vmem:[%s1329_s0 + $0x10] sm:$0xff]  }
  0x21   :  { %735 = vmatprep.subr.mxu0 %v842_v2  ;;  %764 = vmatprep.subr.mxu1 %v842_v2  ;;  %s923_s25 = sld [smem:[#allocation2 + $0x84]]  ;;  %v948_v15 = vld [vmem:[%s1329_s0] sm:$0xff]   ;;  %v72_v21 = vunpack.c.l.bf16 %v953_v16  ;;  %v83_v22 = vunpack.c.h.bf16 %v953_v16  ;;  %v685_v23 = vld [vmem:[%s1333_s4 + $0x98] sm:$0xff]  ;;  %v336_v24 = vld [vmem:[%s1333_s4 + $0x30] sm:$0xff]  ;;  %v94_v29 = vunpack.c.l.bf16 %v959_v18  ;;  %v105_v36 = vunpack.c.h.bf16 %v959_v18 }
  0x22   :  { %736 = vmatpush3.msra.mxu0 %v689_v5  ;;  %765 = vmatpush3.msra.mxu1 %v340_v6  ;;  %s933_s2 = sld [smem:[#allocation2 + $0x85]]  ;;  %v50_v19 = vunpack.c.l.bf16 %v948_v15  ;;  %v61_v20 = vunpack.c.h.bf16 %v948_v15  ;;  %v684_v30 = vld [vmem:[%s1333_s4 + $0x90] sm:$0xff]  ;;  %v335_v31 = vld [vmem:[%s1333_s4 + $0x28] sm:$0xff]  ;;  %v997_v33 = vld [vmem:[%s1329_s0 + $0x18] sm:$0xff]  }
  0x23   :  { %737 = vmatprep.subr.mxu0 %v842_v2  ;;  %766 = vmatprep.subr.mxu1 %v842_v2  ;;  %v55_v13 = vstv %s899_s13  ;;  %s961_s13 = sld [smem:[#allocation2 + $0x86]]  ;;  %v683_v37 = vld [vmem:[%s1333_s4 + $0x88] sm:$0xff]  ;;  %v334_v38 = vld [vmem:[%s1333_s4 + $0x20] sm:$0xff]  ;;  %v116_v42 = vunpack.c.l.bf16 %v997_v33  ;;  %v333_v44 = vld [vmem:[%s1333_s4 + $0x18] sm:$0xff]  ;;  %v127_v49 = vunpack.c.h.bf16 %v997_v33 }
  0x24   :  { %738 = vmatpush3.msra.mxu0 %v688_v7  ;;  %767 = vmatpush3.msra.mxu1 %v339_v8  ;;  %v66_v14 = vstv %s901_s14  ;;  %s976_s21 = sld [smem:[#allocation2 + $0x87]]  ;;  %v56_v26 = vmul.f32 %v55_v13, %v50_v19  ;;  %v682_v43 = vld [vmem:[%s1333_s4 + $0x80] sm:$0xff]  ;;  %v681_v50 = vld [vmem:[%s1333_s4 + $0x78] sm:$0xff]  ;;  %v332_v51 = vld [vmem:[%s1333_s4 + $0x10] sm:$0xff] }
  0x25   :  { %739 = vmatprep.subr.mxu0 %v842_v2  ;;  %768 = vmatprep.subr.mxu1 %v842_v2  ;;  %v77_v17 = vstv %s911_s19  ;;  %v67_v27 = vmul.f32 %v66_v14, %v61_v20  ;;  %s999_s28 = sld [smem:[#allocation2 + $0x88]]  ;;  %v1030_v46 = vld [vmem:[%s1329_s0 + $0x20] sm:$0xff]   ;;  %v680_v56 = vld [vmem:[%s1333_s4 + $0x70] sm:$0xff]  ;;  %v331_v57 = vld [vmem:[%s1333_s4 + $0x8] sm:$0xff] }
  0x26   :  { %740 = vmatpush3.msra.mxu0 %v687_v9  ;;  %769 = vmatpush3.msra.mxu1 %v338_v10  ;;  %v88_v25 = vstv %s913_s20  ;;  %v78_v28 = vmul.f32 %v77_v17, %v72_v21  ;;  %s1013_s7 = sld [smem:[#allocation2 + $0x89]]  ;;  %v138_v55 = vunpack.c.l.bf16 %v1030_v46  ;;  %v1065_v59 = vld [vmem:[%s1329_s0 + $0x28] sm:$0xff]   ;;  %v149_v62 = vunpack.c.h.bf16 %v1030_v46  ;;  %v330_v1 = vld [vmem:[%s1333_s4] sm:$0xff]  ;;  %v1096_v7 = vld [vmem:[%s1329_s0 + $0x30] sm:$0xff]  }
  0x27   :  { %741 = vmatprep.subr.mxu0 %v842_v2  ;;  %770 = vmatprep.subr.mxu1 %v842_v2  ;;  %v99_v32 = vstv %s923_s25  ;;  %v68_v34 = vadd.f32 %v67_v27, %v56_v26  ;;  %v89_v35 = vmul.f32 %v88_v25, %v83_v22  ;;  %s1032_s15 = sld [smem:[#allocation2 + $0x8a]]  ;;  %v679_v63 = vld [vmem:[%s1333_s4 + $0x68] sm:$0xff]  ;;  %v160_v5 = vunpack.c.l.bf16 %v1065_v59 }
  0x28   :  { %742 = vmatpush3.msra.mxu0 %v686_v11  ;;  %771 = vmatpush3.msra.mxu1 %v337_v12  ;;  %v110_v39 = vstv %s933_s2  ;;  %v100_v41 = vmul.f32 %v99_v32, %v94_v29  ;;  %s1046_s18 = sld [smem:[#allocation2 + $0x8b]]  ;;  %v171_v10 = vunpack.c.h.bf16 %v1065_v59  ;;  %v182_v14 = vunpack.c.l.bf16 %v1096_v7  ;;  %v1134_v32 = vld [vmem:[%s1329_s0 + $0x40] sm:$0xff]  }
  0x29   :  { %743 = vmatprep.subr.mxu0 %v842_v2  ;;  %772 = vmatprep.subr.mxu1 %v842_v2  ;;  %v79_v40 = vadd.f32 %v78_v28, %v68_v34  ;;  %v121_v45 = vstv %s961_s13  ;;  %v111_v48 = vmul.f32 %v110_v39, %v105_v36  ;;  %s1051_s19 = sld [smem:[#allocation2 + $0x8c]]  ;;  %v193_v26 = vunpack.c.h.bf16 %v1096_v7 }
  0x2a   :  { %744 = vmatpush3.msra.mxu0 %v685_v23  ;;  %773 = vmatpush3.msra.mxu1 %v336_v24  ;;  %v132_v52 = vstv %s976_s21  ;;  %v122_v54 = vmul.f32 %v121_v45, %v116_v42  ;;  %s1067_s27 = sld [smem:[#allocation2 + $0x8d]]  ;;  %v1118_v23 = vld [vmem:[%s1329_s0 + $0x38] sm:$0xff]  }
  0x2b   :  { %745 = vmatprep.subr.mxu0 %v842_v2  ;;  %774 = vmatprep.subr.mxu1 %v842_v2  ;;  %v90_v47 = vadd.f32 %v89_v35, %v79_v40  ;;  %v143_v58 = vstv %s999_s28  ;;  %v133_v61 = vmul.f32 %v132_v52, %v127_v49  ;;  %s1072_s25 = sld [smem:[#allocation2 + $0x8e]]  ;;  %v215_v35 = vunpack.c.h.bf16 %v1118_v23 }
  0x2c   :  { %746 = vmatpush3.msra.mxu0 %v684_v30  ;;  %775 = vmatpush3.msra.mxu1 %v335_v31  ;;  %v154_v0 = vstv %s1013_s7  ;;  %s1080_s3 = sld [smem:[#allocation2 + $0x8f]]  ;;  %v144_v4 = vmul.f32 %v143_v58, %v138_v55  ;;  %v204_v31 = vunpack.c.l.bf16 %v1118_v23 }
  0x2d   :  { %747 = vmatprep.subr.mxu0 %v842_v2  ;;  %776 = vmatprep.subr.mxu1 %v842_v2  ;;  %v101_v53 = vadd.f32 %v100_v41, %v90_v47  ;;  %s1088_s9 = sld [smem:[#allocation2 + $0x90]]  ;;  %v165_v6 = vstv %s1032_s15  ;;  %v155_v9 = vmul.f32 %v154_v0, %v149_v62 }
  0x2e   :  { %748 = vmatpush3.msra.mxu0 %v683_v37  ;;  %777 = vmatpush3.msra.mxu1 %v334_v38  ;;  %s1098_s4 = sld [smem:[#allocation2 + $0x91]]  ;;  %v176_v11 = vstv %s1046_s18  ;;  %v166_v13 = vmul.f32 %v165_v6, %v160_v5 }
  0x2f   :  { %749 = vmatprep.subr.mxu0 %v842_v2  ;;  %778 = vmatprep.subr.mxu1 %v842_v2  ;;  %v112_v60 = vadd.f32 %v111_v48, %v101_v53  ;;  %s1105_s10 = sld [smem:[#allocation2 + $0x92]]  ;;  %v187_v17 = vstv %s1051_s19  ;;  %v177_v25 = vmul.f32 %v176_v11, %v171_v10  ;;  %v1165_v53 = vld [vmem:[%s1329_s0 + $0x48] sm:$0xff]  }
  0x30   :  { %750 = vmatpush3.msra.mxu0 %v682_v43  ;;  %779 = vmatpush3.msra.mxu1 %v333_v44  ;;  %s49_s11 = sld [smem:[#allocation2]]  ;;  %v198_v27 = vstv %s1067_s27  ;;  %v188_v30 = vmul.f32 %v187_v17, %v182_v14  ;;  %v226_v44 = vunpack.c.l.bf16 %v1134_v32  ;;  %v248_v0 = vunpack.c.l.bf16 %v1165_v53 }
  0x31   :  { %751 = vmatprep.subr.mxu0 %v842_v2  ;;  %780 = vmatprep.subr.mxu1 %v842_v2  ;;  %v123_v3 = vadd.f32 %v122_v54, %v112_v60  ;;  %s607_s12 = sld [smem:[#allocation2 + $0x1]]  ;;  %v209_v34 = vstv %s1072_s25  ;;  %v199_v39 = vmul.f32 %v198_v27, %v193_v26  ;;  %v259_v11 = vunpack.c.h.bf16 %v1165_v53  ;;  %v515_v53 = vld [vmem:[%s1334_s5 + $0x18] sm:$0xff] }
  0x32   :  { %752 = vmatpush3.msra.mxu0 %v681_v50  ;;  %781 = vmatpush3.msra.mxu1 %v332_v51  ;;  %s610_s13 = sld [smem:[#allocation2 + $0x2]]  ;;  %v220_v43 = vstv %s1080_s3  ;;  %v210_v50 = vmul.f32 %v209_v34, %v204_v31 }
  0x33   :  { %753 = vmatprep.subr.mxu0 %v842_v2  ;;  %782 = vmatprep.subr.mxu1 %v842_v2  ;;  %v134_v8 = vadd.f32 %v133_v61, %v123_v3  ;;  %s1123_s14 = sld [smem:[#allocation2 + $0x3]]  ;;  %v231_v52 = vstv %s1088_s9 }
  0x34   :  { %754 = vmatpush3.msra.mxu0 %v680_v56  ;;  %783 = vmatpush3.msra.mxu1 %v331_v57  ;;  %s1126_s17 = sld [smem:[#allocation2 + $0x4]]  ;;  %v237_v57 = vunpack.c.h.bf16 %v1134_v32  ;;  %v242_v60 = vstv %s1098_s4 }
  0x35   :  { %755 = vmatprep.subr.mxu0 %v842_v2  ;;  %784 = vmatprep.subr.mxu1 %v842_v2  ;;  %v145_v12 = vadd.f32 %v144_v4, %v134_v8  ;;  %s1136_s20 = sld [smem:[#allocation2 + $0x5]]  ;;  %v253_v3 = vstv %s1105_s10  ;;  %v1193_v4 = vld [vmem:[%s1329_s0 + $0x50] sm:$0xff]  }
  0x36   :  { %756 = vmatpush3.msra.mxu0 %v679_v63  ;;  %757 = vmatprep.mubr.msk.f32.mxu0 %vm843_vm1, %v842_v2  ;;  %v51_v37 = vstv %s49_s11  ;;  %s1140_s22 = sld [smem:[#allocation2 + $0x6]]  ;;  %v232_v63 = vmul.f32 %v231_v52, %v226_v44 }
  0x37   :  { %785 = vmatpush3.msra.mxu1 %v330_v1  ;;  %786 = vmatprep.mubr.msk.f32.mxu1 %vm843_vm1, %v842_v2  ;;  %v156_v24 = vadd.f32 %v155_v9, %v145_v12  ;;  %v52_v40 = vmul.f32 %v51_v37, %v50_v19  ;;  %v62_v41 = vstv %s607_s12  ;;  %s1146_s21 = sld [smem:[#allocation2 + $0x7]]  ;;  %v243_v9 = vmul.f32 %v242_v60, %v237_v57 }
  0x38   :  { %789 = vmatprep.subr.mxu0 %v842_v2  ;;  %s1150_s23 = sld [smem:[#allocation2 + $0x93]]  ;;  %v63_v45 = vmul.f32 %v62_v41, %v61_v20  ;;  %v73_v47 = vstv %s610_s13 }
  0x39   :  { %v167_v28 = vadd.f32 %v166_v13, %v156_v24  ;;  %v74_v19 = vmul.f32 %v73_v47, %v72_v21  ;;  %v84_v51 = vstv %s1123_s14  ;;  %s1159_s24 = sld [smem:[#allocation2 + $0x8]]  ;;  %v221_v21 = vmul.f32 %v220_v43, %v215_v35 }
  0x3a   :  { %s1167_s25 = sld [smem:[#allocation2 + $0x94]]  ;;  %v64_v15 = vadd.f32 %v63_v45, %v52_v40  ;;  %v85_v20 = vmul.f32 %v84_v51, %v83_v22  ;;  %v95_v54 = vstv %s1126_s17 }
  0x3b   :  { %v178_v38 = vadd.f32 %v177_v25, %v167_v28  ;;  %v106_v58 = vstv %s1136_s20  ;;  %s1176_s28 = sld [smem:[#allocation2 + $0x9]]  ;;  %v96_v16 = vmul.f32 %v95_v54, %v94_v29  ;;  %v270_v25 = vunpack.c.l.bf16 %v1193_v4 }
  0x3c   :  { %s1179_s29 = sld [smem:[#allocation2 + $0x95]]  ;;  %v75_v61 = vadd.f32 %v74_v19, %v64_v15  ;;  %v117_v1 = vstv %s1140_s22  ;;  %v107_v6 = vmul.f32 %v106_v58, %v105_v36  ;;  %v254_v36 = vmul.f32 %v253_v3, %v248_v0  ;;  %v1245_v19 = vld [vmem:[%s1329_s0 + $0x60] sm:$0xf] }
  0x3d   :  { %v189_v48 = vadd.f32 %v188_v30, %v178_v38  ;;  %s1187_s3 = sld [smem:[#allocation2 + $0xa]]  ;;  %v128_v12 = vstv %s1146_s21  ;;  %v118_v24 = vmul.f32 %v117_v1, %v116_v42  ;;  %v1220_v30 = vld [vmem:[%s1329_s0 + $0x58] sm:$0xff]   ;;  %v314_v60 = vunpack.c.l.bf16 %v1245_v19  ;;  %v512_v19 = vld [vmem:[%s1334_s5] sm:$0xff] }
  0x3e   :  { %s1195_s9 = sld [smem:[#allocation2 + $0x96]]  ;;  %v86_v29 = vadd.f32 %v85_v20, %v75_v61  ;;  %v264_v13 = vstv %s1150_s23  ;;  %v129_v34 = vmul.f32 %v128_v12, %v127_v49  ;;  %v292_v49 = vunpack.c.l.bf16 %v1220_v30 }
  0x3f   :  { %v200_v56 = vadd.f32 %v199_v39, %v189_v48  ;;  %s1203_s7 = sld [smem:[#allocation2 + $0xb]]  ;;  %v139_v27 = vstv %s1159_s24  ;;  %v265_v38 = vmul.f32 %v264_v13, %v259_v11  ;;  %v281_v39 = vunpack.c.h.bf16 %v1193_v4  ;;  %v514_v4 = vld [vmem:[%s1334_s5 + $0x10] sm:$0xff] }
  0x40   :  { %s1206_s2 = sld [smem:[#allocation2 + $0x97]]  ;;  %v97_v17 = vadd.f32 %v96_v16, %v86_v29  ;;  %v275_v28 = vstv %s1167_s25  ;;  %v140_v45 = vmul.f32 %v139_v27, %v138_v55  ;;  %v303_v20 = vunpack.c.h.bf16 %v1220_v30  ;;  %v513_v30 = vld [vmem:[%s1334_s5 + $0x8] sm:$0xff] }
  0x41   :  { %v211_v22 = vadd.f32 %v210_v50, %v200_v56  ;;  %s1214_s4 = sld [smem:[#allocation2 + $0xc]]  ;;  %v150_v40 = vstv %s1176_s28  ;;  %v276_v33 = vmul.f32 %v275_v28, %v270_v25 }
  0x42   :  { %s1222_s12 = sld [smem:[#allocation2 + $0x98]]  ;;  %v108_v42 = vadd.f32 %v107_v6, %v97_v17  ;;  %v286_v41 = vstv %s1179_s29  ;;  %v151_v55 = vmul.f32 %v150_v40, %v149_v62 }
  0x43   :  { %v222_v8 = vadd.f32 %v221_v21, %v211_v22  ;;  %s1230_s15 = sld [smem:[#allocation2 + $0xd]]  ;;  %v161_v48 = vstv %s1187_s3  ;;  %v287_v15 = vmul.f32 %v286_v41, %v281_v39 }
  0x44   :  { %v119_v43 = vadd.f32 %v118_v24, %v108_v42  ;;  %s1239_s16 = sld [smem:[#allocation2 + $0xe]]  ;;  %v297_v50 = vstv %s1195_s9  ;;  %v162_v58 = vmul.f32 %v161_v48, %v160_v5 }
  0x45   :  { %v233_v18 = vadd.f32 %v232_v63, %v222_v8  ;;  %v172_v54 = vstv %s1203_s7  ;;  %s1253_s17 = sld [smem:[#allocation2 + $0xf]]  ;;  %v298_v62 = vmul.f32 %v297_v50, %v292_v49 }
  0x46   :  { %v130_v51 = vadd.f32 %v129_v34, %v119_v43  ;;  %v308_v56 = vstv %s1206_s2  ;;  %s1256_s18 = sld [smem:[#allocation4 + $0x1]]  ;;  %v173_v63 = vmul.f32 %v172_v54, %v171_v10 }
  0x47   :  { %v244_v37 = vadd.f32 %v243_v9, %v233_v18  ;;  %v183_v61 = vstv %s1214_s4  ;;  %s1264_s0 = sld [smem:[#allocation2 + $0x10]]  ;;  %v309_v5 = vmul.f32 %v308_v56, %v303_v20 }
  0x48   :  { %v141_v21 = vadd.f32 %v140_v45, %v130_v51  ;;  %v319_v16 = vstv %s1222_s12  ;;  %s655_s19 = sld [smem:[#allocation2 + $0x11]]  ;;  %v184_v6 = vmul.f32 %v183_v61, %v182_v14 }
  0x49   :  { %v255_v47 = vadd.f32 %v254_v36, %v244_v37  ;;  %v194_v3 = vstv %s1230_s15  ;;  %v320_v9 = vmul.f32 %v319_v16, %v314_v60  ;;  %s658_s20 = sld [smem:[#allocation2 + $0x12]] }
  0x4a   :  { %v152_v22 = vadd.f32 %v151_v55, %v141_v21  ;;  %v205_v12 = vstv %s1239_s16  ;;  %v195_v10 = vmul.f32 %v194_v3, %v193_v26  ;;  %s661_s22 = sld [smem:[#allocation2 + $0x13]]  ;;  %v511_v21 = vld [vmem:[%s1330_s1] sm:$0xff] }
  0x4b   :  { %v266_v52 = vadd.f32 %v265_v38, %v255_v47  ;;  %v216_v17 = vstv %s1253_s17  ;;  %v206_v36 = vmul.f32 %v205_v12, %v204_v31  ;;  %s664_s21 = sld [smem:[#allocation2 + $0x14]] }
  0x4c   :  { %v163_v29 = vadd.f32 %v162_v58, %v152_v22  ;;  %v327_v24 = vstv %s1256_s18  ;;  %v217_v42 = vmul.f32 %v216_v17, %v215_v35  ;;  %s667_s23 = sld [smem:[#allocation2 + $0x15]] }
  0x4d   :  { %v277_v46 = vadd.f32 %v276_v33, %v266_v52  ;;  %v227_v14 = vstv %s1264_s0  ;;  %s670_s24 = sld [smem:[#allocation2 + $0x16]] }
  0x4e   :  { %v174_v59 = vadd.f32 %v173_v63, %v163_v29  ;;  %v238_v37 = vstv %s655_s19  ;;  %v228_v26 = vmul.f32 %v227_v14, %v226_v44  ;;  %s673_s26 = sld [smem:[#allocation2 + $0x17]] }
  0x4f   :  { %v288_v1 = vadd.f32 %v287_v15, %v277_v46  ;;  %v249_v38 = vstv %s658_s20  ;;  %v239_v31 = vmul.f32 %v238_v37, %v237_v57  ;;  %s676_s27 = sld [smem:[#allocation2 + $0x18]] }
  0x50   :  { %v185_v18 = vadd.f32 %v184_v6, %v174_v59  ;;  %v260_v41 = vstv %s661_s22  ;;  %v250_v23 = vmul.f32 %v249_v38, %v248_v0  ;;  %s322_s25 = sld [smem:[#allocation4]] }
  0x51   :  { %v299_v8 = vadd.f32 %v298_v62, %v288_v1  ;;  %v271_v35 = vstv %s664_s21  ;;  %v261_v47 = vmul.f32 %v260_v41, %v259_v11 }
  0x52   :  { %v196_v28 = vadd.f32 %v195_v10, %v185_v18  ;;  %v282_v44 = vstv %s667_s23  ;;  %v272_v48 = vmul.f32 %v271_v35, %v270_v25 }
  0x53   :  { %v310_v13 = vadd.f32 %v309_v5, %v299_v8  ;;  %v293_v50 = vstv %s670_s24  ;;  %v283_v57 = vmul.f32 %v282_v44, %v281_v39 }
  0x54   :  { %v207_v7 = vadd.f32 %v206_v36, %v196_v28  ;;  %v304_v51 = vstv %s673_s26  ;;  %v294_v55 = vmul.f32 %v293_v50, %v292_v49 }
  0x55   :  { %v321_v27 = vadd.f32 %v320_v9, %v310_v13  ;;  %v315_v52 = vstv %s676_s27  ;;  %v305_v25 = vmul.f32 %v304_v51, %v303_v20 }
  0x56   :  { %v218_v40 = vadd.f32 %v217_v42, %v207_v7  ;;  %v316_v49 = vmul.f32 %v315_v52, %v314_v60  ;;  %v323_v54 = vstv %s322_s25 }
  0x57   :  { %v328_v34 = vadd.f32 %v327_v24, %v321_v27 }
  0x58   :  { %v229_v43 = vadd.f32 %v228_v26, %v218_v40 }
  0x59   :  { %804 = vtanh.f32 %v328_v34 }
  0x5a   :  { %v240_v45 = vadd.f32 %v239_v31, %v229_v43 }
  0x5c   :  { %v251_v33 = vadd.f32 %v250_v23, %v240_v45 }
  0x5e   :  { %v262_v32 = vadd.f32 %v261_v47, %v251_v33 }
  0x60   :  { %v273_v0 = vadd.f32 %v272_v48, %v262_v32 }
  0x62   :  { %v284_v15 = vadd.f32 %v283_v57, %v273_v0 }
  0x64   :  { %v295_v39 = vadd.f32 %v294_v55, %v284_v15 }
  0x66   :  { %v805_v11 = vpop.eup %804  ;;  %v306_v20 = vadd.f32 %v305_v25, %v295_v39 }
  0x67   :  { %758 = vmatmul.mubr.msk.f32.vlgmr.msra.gmra.mxu0 %vm357_vm2, %v805_v11 }
  0x68   :  { %790 = vmatpush3.msra.mxu0 %v515_v53  ;;  %797 = vmatprep.mubr.msk.f32.mxu0 %vm843_vm1, %v842_v2  ;;  %v317_v56 = vadd.f32 %v316_v49, %v306_v20 }
  0x69   :  { %791 = vmatprep.subr.mxu0 %v842_v2 }
  0x6a   :  { %792 = vmatpush3.msra.mxu0 %v514_v4  ;;  %v324_v58 = vadd.f32 %v323_v54, %v317_v56 }
  0x6b   :  { %793 = vmatprep.subr.mxu0 %v842_v2 }
  0x6c   :  { %794 = vmatpush3.msra.mxu0 %v513_v30  ;;  %806 = vtanh.f32 %v324_v58 }
  0x6d   :  { %795 = vmatprep.subr.mxu0 %v842_v2 }
  0x6e   :  { %796 = vmatpush3.msra.mxu0 %v512_v19 }
  0x6f   :  { %798 = vmatmul.mubr.msk.f32.vlgmr.msra.gmra.mxu0 %vm516_vm3, %v511_v21 }
  0x79   :  { %v807_v46 = vpop.eup %806 }
  0x7a   :  { %787 = vmatmul.mubr.msk.f32.vlgmr.msra.gmra.mxu1 %vm357_vm2, %v807_v46 }
 0x127   :  { %v431_v62 = vpop.f32.mrf.mxu0 }
 0x129   :  { %v759_v60 = vpop.f32.mrf.mxu0 }
 0x12f   :  { %v586_v61 = vpop.f32.mrf.mxu0 }
 0x131   :  { %v799_v16 = vpop.f32.mrf.mxu0 }
 0x13a   :  { %v507_v22 = vpop.f32.mrf.mxu1 }
 0x13b   :  { %v508_v63 = vadd.f32 %v507_v22, %v431_v62 }
 0x13c   :  { %v788_v1 = vpop.f32.mrf.mxu1 }
 0x13d   :  { %v590_v5 = vadd.f32 %v586_v61, %v508_v63 }
 0x13f   :  { %v697_v3 = vmul.f32 -1.442695, %v590_v5 }
 0x141   :  { %808 = vpow2.f32 %v697_v3 }
 0x14e   :  { %v809_v29 = vpop.eup %808 }
 0x14f   :  { %v594_v6 = vadd.f32 1.0, %v809_v29 }
 0x151   :  { %810 = vrcp.f32 %v594_v6 }
 0x15e   :  { %v811_v2 = vpop.eup %810 }
 0x15f   :  { %598 = vst.msk [vmem:[%s1335_s6] sm:$0xff] %vm597_vm4, %v811_v2 }
 0x160   :  { %603 = vsyncpa [#allocation3], 1 }
 0x161   :  { %604 = vsyncpa [#allocation5], 1 }

</bundles_post_ra>
